<compile_context>
chip_gen: v5e
topology: v5e:2x2
jax: 0.10.0
libtpu: 0.0.40
codegen_flags: <defaults>
</compile_context>

<pallas_src>
import jax
import jax.numpy as jnp
from jax.experimental import pallas as pl
from jax.experimental.pallas import tpu as pltpu


def _round_up(x, m):
    return ((x + m - 1) // m) * m


def _vmem_capacity_bytes():
    """Physical VMEM per TensorCore; conservative fallback if unqueryable."""
    try:
        info = pltpu.get_tpu_info()
        cap = getattr(info, "vmem_capacity_bytes", None)
        if cap:
            return int(cap)
    except Exception:
        pass
    return 64 * 1024 * 1024  # v7x-sized fallback; safe on 128 MiB parts too.


# -----------------------------------------------------------------------------
# Kernel 1: BatchNorm1d with training-mode batch statistics.
# N x C is tiny (~64 KiB) -> single invocation, whole arrays resident in VMEM.
# Emits both the f32 bn features (module output) and a matmul-dtype (bf16)
# copy so the classifier kernel never re-casts activations from f32.
# -----------------------------------------------------------------------------
def _bn_kernel(x_ref, gamma_ref, beta_ref, bn_ref, bn_mm_ref):
    x = x_ref[...]
    if x.dtype != jnp.float32:
        x = x.astype(jnp.float32)
    mean = jnp.mean(x, axis=0, keepdims=True)               # (1, C)
    diff = x - mean
    var = jnp.mean(diff * diff, axis=0, keepdims=True)      # biased variance
    inv_std = jax.lax.rsqrt(var + 1e-5)                     # BatchNorm1d eps
    bn = diff * inv_std * gamma_ref[...] + beta_ref[...]    # (N, C) f32
    bn_ref[...] = bn
    bn_mm_ref[...] = bn.astype(bn_mm_ref.dtype)


# -----------------------------------------------------------------------------
# Kernel 2: bias-free classifier = pure weight-streaming matmul.
# One grid step = one (tp, C) slab of the ORIGINAL (P, C) weight (contiguous
# HBM rows). Contraction over C via dot_general ((1,), (1,)) -> no transposed
# weight copy ever exists in HBM. f32 accumulation on the MXU.
# No cross-step state -> the P axis is safe to split across v7x's two TCs.
# -----------------------------------------------------------------------------
def _classifier_kernel(bn_ref, w_ref, out_ref):
    out_ref[...] = jax.lax.dot_general(
        bn_ref[...], w_ref[...],
        dimension_numbers=(((1,), (1,)), ((), ())),
        preferred_element_type=jnp.float32,
    ).astype(out_ref.dtype)


def bn_classifier(features, gamma, beta, weight, *, tp=None):
    """features: (N, C, 1, 1) or (N, C); gamma/beta: (C,); weight: (P, C).

    `weight` is streamed exactly as passed (layout + dtype). Keep it stored
    persistently in bf16 outside this function to halve its HBM traffic; it is
    never transposed, cast, or padded per call.

    Returns (bn_features (N, C) f32, cls_score (N, P) f32).
    """
    # Robust "squeeze": keep the batch dim even when N == 1.
    if features.ndim == 4:
        x = features.reshape(features.shape[0], features.shape[1])
    else:
        x = features
    n, c = x.shape
    p = weight.shape[0]
    assert weight.shape[1] == c
    mm_dtype = weight.dtype
    w_item = jnp.dtype(mm_dtype).itemsize

    # ---------------- generation-aware tile / VMEM budgets ----------------
    vmem_cap = _vmem_capacity_bytes()
    weight_budget = max(8 << 20, vmem_cap // 4)   # double-buffered weight slab
    vmem_limit = max(32 << 20, vmem_cap // 2)

    p128 = _round_up(p, 128)
    if tp is None:
        tp = (weight_budget // (2 * c * w_item)) // 128 * 128
        tp = max(128, min(tp, p128))
    tp = max(128, min(tp, p128))
    # Re-balance: same slab count, but masked-tail waste shrinks to < 128 cols.
    num_slabs = pl.cdiv(p128, tp)
    tp = _round_up(pl.cdiv(p128, num_slabs), 128)
    assert tp % 128 == 0

    gamma2d = gamma.reshape(1, c).astype(jnp.float32)
    beta2d = beta.reshape(1, c).astype(jnp.float32)

    # ---------------- BN: single step, everything in VMEM ----------------
    bn_f32, bn_mm = pl.pallas_call(
        _bn_kernel,
        out_shape=(
            jax.ShapeDtypeStruct((n, c), jnp.float32),
            jax.ShapeDtypeStruct((n, c), mm_dtype),
        ),
    )(x, gamma2d, beta2d)

    # ------------- classifier: weight-streaming matmul over P -------------
    grid = (pl.cdiv(p, tp),)
    cost = pl.CostEstimate(
        flops=2 * n * c * p,
        transcendentals=0,
        bytes_accessed=(n * c * w_item            # bn activations (mm dtype)
                        + p * c * w_item          # classifier weight
                        + n * p * 4),             # class scores
    )
    cls = pl.pallas_call(
        _classifier_kernel,
        out_shape=jax.ShapeDtypeStruct((n, p), jnp.float32),
        grid=grid,
        in_specs=[
            pl.BlockSpec((n, c), lambda j: (0, 0)),    # bn activations (reused)
            pl.BlockSpec((tp, c), lambda j: (j, 0)),   # weight slab (streamed)
        ],
        out_specs=pl.BlockSpec((n, tp), lambda j: (0, j)),
        compiler_params=pltpu.CompilerParams(
            dimension_semantics=("parallel",),         # megacore-shardable (v7x)
            vmem_limit_bytes=vmem_limit,
        ),
        cost_estimate=cost,
    )(bn_mm, weight)

    return bn_f32, cls


if __name__ == "__main__":
    # Small TPU-friendly shapes consistent with the head (channel / pid_num
    # scaled down). P=384 with tp=256 exercises the masked partial final slab.
    N, C, P = 8, 256, 384

    key = jax.random.PRNGKey(0)
    k_feat, k_w = jax.random.split(key)

    # Pooled features as produced upstream: (N, C, 1, 1)
    features = jax.random.normal(k_feat, (N, C, 1, 1), dtype=jnp.float32)

    # Parameter init mirroring weights_init_kaiming / weights_init_classifier.
    gamma = jnp.ones((C,), dtype=jnp.float32)            # BN weight = 1
    beta = jnp.zeros((C,), dtype=jnp.float32)            # BN bias = 0
    weight_f32 = 0.001 * jax.random.normal(k_w, (P, C), dtype=jnp.float32)
    # Persistent bf16 storage of the classifier weight (done once at init;
    # never re-materialized per forward call).
    weight = weight_f32.astype(jnp.bfloat16)

    bn_features, cls_score = bn_classifier(features, gamma, beta, weight, tp=256)
    jax.block_until_ready((bn_features, cls_score))

    # Pure-JAX reference (f32 everywhere).
    x = features.reshape(N, C)
    mean = jnp.mean(x, axis=0, keepdims=True)
    var = jnp.mean((x - mean) ** 2, axis=0, keepdims=True)
    bn_ref = (x - mean) / jnp.sqrt(var + 1e-5) * gamma + beta
    cls_ref = bn_ref @ weight_f32.T

    assert bn_features.shape == (N, C) and cls_score.shape == (N, P)
    assert jnp.allclose(bn_features, bn_ref, atol=1e-4, rtol=1e-4)
    # Classifier path uses bf16 operands (f32 accumulation) -> looser tolerance.
    assert jnp.allclose(cls_score, cls_ref, atol=1e-3, rtol=2e-2)

    print("KERNEL_OK")
</pallas_src>

<mosaic_0001>
module attributes {stable_mosaic.version = 11 : i64} {
  func.func @_bn_kernel(%arg0: memref<8x256xf32, #tpu.memory_space<vmem>>, %arg1: memref<1x256xf32, #tpu.memory_space<vmem>>, %arg2: memref<1x256xf32, #tpu.memory_space<vmem>>, %arg3: memref<8x256xf32, #tpu.memory_space<vmem>>, %arg4: memref<8x256xbf16, #tpu.memory_space<vmem>>) attributes {dimension_semantics = [], scalar_prefetch = 0 : i64, scratch_operands = 0 : i64, tpu.core_type = #tpu.core_type<tc>} {
    %c0 = arith.constant 0 : index
    %c0_0 = arith.constant 0 : index
    %0 = vector.load %arg0[%c0, %c0_0] : memref<8x256xf32, #tpu.memory_space<vmem>>, vector<8x256xf32>
    %cst = arith.constant dense<0.000000e+00> : vector<256xf32>
    %1 = vector.multi_reduction <add>, %0, %cst [0] : vector<8x256xf32> to vector<256xf32>
    %2 = vector.shape_cast %1 : vector<256xf32> to vector<1x256xf32>
    %cst_1 = arith.constant 8.000000e+00 : f32
    %3 = vector.broadcast %cst_1 : f32 to vector<1x256xf32>
    %4 = arith.divf %2, %3 : vector<1x256xf32>
    %5 = vector.broadcast %4 : vector<1x256xf32> to vector<8x256xf32>
    %6 = arith.subf %0, %5 : vector<8x256xf32>
    %7 = arith.mulf %6, %6 : vector<8x256xf32>
    %cst_2 = arith.constant dense<0.000000e+00> : vector<256xf32>
    %8 = vector.multi_reduction <add>, %7, %cst_2 [0] : vector<8x256xf32> to vector<256xf32>
    %9 = vector.shape_cast %8 : vector<256xf32> to vector<1x256xf32>
    %cst_3 = arith.constant 8.000000e+00 : f32
    %10 = vector.broadcast %cst_3 : f32 to vector<1x256xf32>
    %11 = arith.divf %9, %10 : vector<1x256xf32>
    %cst_4 = arith.constant 9.99999974E-6 : f32
    %12 = vector.broadcast %cst_4 : f32 to vector<1x256xf32>
    %13 = arith.addf %11, %12 : vector<1x256xf32>
    %14 = math.rsqrt %13 : vector<1x256xf32>
    %15 = vector.broadcast %14 : vector<1x256xf32> to vector<8x256xf32>
    %16 = arith.mulf %6, %15 : vector<8x256xf32>
    %c0_5 = arith.constant 0 : index
    %c0_6 = arith.constant 0 : index
    %17 = vector.load %arg1[%c0_5, %c0_6] : memref<1x256xf32, #tpu.memory_space<vmem>>, vector<1x256xf32>
    %18 = vector.broadcast %17 : vector<1x256xf32> to vector<8x256xf32>
    %19 = arith.mulf %16, %18 : vector<8x256xf32>
    %c0_7 = arith.constant 0 : index
    %c0_8 = arith.constant 0 : index
    %20 = vector.load %arg2[%c0_7, %c0_8] : memref<1x256xf32, #tpu.memory_space<vmem>>, vector<1x256xf32>
    %21 = vector.broadcast %20 : vector<1x256xf32> to vector<8x256xf32>
    %22 = arith.addf %19, %21 : vector<8x256xf32>
    %c0_9 = arith.constant 0 : index
    %c0_10 = arith.constant 0 : index
    %23 = vector.load %arg3[%c0_9, %c0_10] : memref<8x256xf32, #tpu.memory_space<vmem>>, vector<8x256xf32>
    tpu.vector_store %arg3[%c0_9, %c0_10], %22 {strides = array<i32>} : memref<8x256xf32, #tpu.memory_space<vmem>>, vector<8x256xf32>,
    %24 = arith.truncf %22 : vector<8x256xf32> to vector<8x256xbf16>
    %c0_11 = arith.constant 0 : index
    %c0_12 = arith.constant 0 : index
    %25 = vector.load %arg4[%c0_11, %c0_12] : memref<8x256xbf16, #tpu.memory_space<vmem>>, vector<8x256xbf16>
    tpu.vector_store %arg4[%c0_11, %c0_12], %24 {strides = array<i32>} : memref<8x256xbf16, #tpu.memory_space<vmem>>, vector<8x256xbf16>,
    return
  }
}

</mosaic_0001>

<bundles_post_ra>
// kernel: tpu_custom_call.1
= control target key start
LH: loop header
LB: loop body
LE: loop exit
PB: predicated region body
PF: predicated region fallthrough
CT: control target
= control target key end

     0   :  { %10 = vsyncpa [#allocation3], 0  ;;  %s364_s0 = inlined_call_operand.hbm [shape: f32[8,256], index: 0, kind: input, shape index: {}]   ;;  %s365_s1 = inlined_call_operand.hbm [shape: f32[1,256], index: 1, kind: input, shape index: {}]   ;;  %s366_s2 = inlined_call_operand.hbm [shape: f32[1,256], index: 2, kind: input, shape index: {}]   ;;  %s367_s3 = inlined_call_operand.hbm [shape: f32[8,256], index: 3, kind: output, shape index: {0}]   ;;  %s368_s4 = inlined_call_operand.hbm [shape: bf16[8,256], index: 4, kind: output, shape index: {1}]  }
   0x1   :  { %11 = vsyncpa [#allocation6], 0 }
   0x2   :  { %12 = vsyncpa [#allocation4], 0  ;;  %s30_s17 = sshll.u32 %s365_s1, 4  ;;  %s31_s17 = int_to_ptr.hbm [resolvable:$true] %s30_s17 }
   0x3   :  { %13 = vsyncpa [#allocation10], 0  ;;  %s318_s18 = smov [#allocation5]   ;;  %s19_s22 = sshll.u32 %s364_s0, 4  ;;  %s20_s22 = int_to_ptr.hbm [resolvable:$true] %s19_s22 }
   0x4   :  { %s32_s19 = sshll.u32 %s318_s18, 4  ;;  %s319_s23 = smov [#allocation2]   ;;  %s33_s19 = int_to_ptr.vmem [resolvable:$true] %s32_s19 }
   0x5   :  { %35 = dma.hbm_to_vmem [thread:$0]  %s31_s17, 32, %s33_s19, [#allocation6]  }
   0x6   :  { %s21_s24 = sshll.u32 %s319_s23, 4  ;;  %s41_s27 = sshll.u32 %s366_s2, 4  ;;  %s22_s24 = int_to_ptr.vmem [resolvable:$true] %s21_s24  ;;  %s42_s27 = int_to_ptr.hbm [resolvable:$true] %s41_s27 }
   0x7   :  { %24 = dma.hbm_to_vmem [thread:$0]  %s20_s22, 256, %s22_s24, [#allocation3]  }
   0x8   :  { %s320_s1 = smov [#allocation7]  }
   0x9   :  { %s43_s28 = sshll.u32 %s320_s1, 4  ;;  %s44_s28 = int_to_ptr.vmem [resolvable:$true] %s43_s28 }
   0xa   :  { %46 = dma.hbm_to_vmem [thread:$0]  %s42_s27, 32, %s44_s28, [#allocation6]  }
   0xb   :  { %310 = dma.done.wait [#allocation3], 256  }
   0xc   :  { %311 = vsyncadd [#allocation3], 4294967040 }
   0xd   :  { %312 = dma.done.wait [#allocation6], 64  }
   0xe   :  { %313 = vsyncadd [#allocation6], 4294967232  ;;  %v321_v0 = vmov 8.0   ;;  %v59_v2 = vld [vmem:[#allocation2] sm:$0xff]  ;;  %v60_v3 = vld [vmem:[#allocation2 + $0x8] sm:$0xff]  ;;  %s322_s0 = smov [#allocation8]  }
   0xf   :  { %184 = vrcp.f32 %v321_v0  ;;  %v61_v4 = vrot.slane %v59_v2, 4  ;;  %v67_v6 = vrot.slane %v60_v3, 4  ;;  %v124_v52 = vld [vmem:[#allocation5] sm:$0x3]  ;;  %v132_v55 = vld [vmem:[#allocation7] sm:$0x3] }
  0x10   :  { %v126_v56 = vperm.slane %v124_v52, 0  ;;  %v127_v59 = vperm.slane %v124_v52, 1  ;;  %v134_v61 = vperm.slane %v132_v55, 0  ;;  %v135_v0 = vperm.slane %v132_v55, 1  ;;  %s149_s2 = sshll.u32 %s322_s0, 4  ;;  %s151_s5 = sshll.u32 %s367_s3, 4  ;;  %s150_s2 = int_to_ptr.vmem [resolvable:$true] %s149_s2  ;;  %s152_s5 = int_to_ptr.hbm [resolvable:$true] %s151_s5 }
  0x11   :  { %v62_v7 = vadd.f32 %v61_v4, %v59_v2  ;;  %v68_v9 = vadd.f32 %v67_v6, %v60_v3  ;;  %s323_s6 = smov [#allocation9]   ;;  %s162_s10 = sshll.u32 %s368_s4, 4  ;;  %s163_s10 = int_to_ptr.hbm [resolvable:$true] %s162_s10 }
  0x12   :  { %s160_s7 = sshll.u32 %s323_s6, 4  ;;  %s161_s7 = int_to_ptr.vmem [resolvable:$true] %s160_s7 }
  0x13   :  { %v63_v10 = vrot.slane %v62_v7, 2  ;;  %v69_v12 = vrot.slane %v68_v9, 2 }
  0x15   :  { %v185_v1 = vpop.eup %184  ;;  %v64_v13 = vadd.f32 %v63_v10, %v62_v7  ;;  %v70_v15 = vadd.f32 %v69_v12, %v68_v9 }
  0x16   :  { %v74_v5 = vmul.f32 8.0, %v185_v1  ;;  %vm78_vm0 = vweird.f32 %v185_v1 }
  0x17   :  { %v65_v16 = vrot.slane %v64_v13, 1  ;;  %v71_v17 = vrot.slane %v70_v15, 1 }
  0x18   :  { %v75_v8 = vsub.f32 1.0, %v74_v5 }
  0x19   :  { %v66_v19 = vadd.f32 %v65_v16, %v64_v13  ;;  %v72_v20 = vadd.f32 %v71_v17, %v70_v15 }
  0x1a   :  { %v76_v11 = vmul.f32 %v185_v1, %v75_v8 }
  0x1c   :  { %v77_v14 = vadd.f32 %v185_v1, %v76_v11 }
  0x1e   :  { %v79_v18 = vsel %vm78_vm0, %v185_v1, %v77_v14 }
  0x1f   :  { %v80_v21 = vmul.f32 %v79_v18, %v66_v19  ;;  %v81_v22 = vmul.f32 %v79_v18, %v72_v20 }
  0x21   :  { %v82_v23 = vsub.f32 %v59_v2, %v80_v21  ;;  %v83_v24 = vsub.f32 %v60_v3, %v81_v22 }
  0x23   :  { %v84_v25 = vmul.f32 %v82_v23, %v82_v23  ;;  %v85_v26 = vmul.f32 %v83_v24, %v83_v24 }
  0x25   :  { %v86_v27 = vrot.slane %v84_v25, 4  ;;  %v92_v28 = vrot.slane %v85_v26, 4 }
  0x27   :  { %v87_v29 = vadd.f32 %v86_v27, %v84_v25  ;;  %v93_v30 = vadd.f32 %v92_v28, %v85_v26 }
  0x29   :  { %v88_v31 = vrot.slane %v87_v29, 2  ;;  %v94_v32 = vrot.slane %v93_v30, 2 }
  0x2b   :  { %v89_v33 = vadd.f32 %v88_v31, %v87_v29  ;;  %v95_v34 = vadd.f32 %v94_v32, %v93_v30 }
  0x2d   :  { %v90_v35 = vrot.slane %v89_v33, 1  ;;  %v96_v36 = vrot.slane %v95_v34, 1 }
  0x2f   :  { %v91_v37 = vadd.f32 %v90_v35, %v89_v33  ;;  %v97_v38 = vadd.f32 %v96_v36, %v95_v34 }
  0x31   :  { %v98_v39 = vmul.f32 %v91_v37, %v79_v18  ;;  %v99_v40 = vmul.f32 %v97_v38, %v79_v18 }
  0x33   :  { %v100_v41 = vadd.f32 1e-05, %v98_v39  ;;  %v101_v42 = vadd.f32 1e-05, %v99_v40 }
  0x35   :  { %186 = vrsqrt.f32 %v100_v41  ;;  %vm108_vm1 = vweird.f32 %v100_v41  ;;  %vm118_vm3 = vweird.f32 %v101_v42 }
  0x36   :  { %188 = vrsqrt.f32 %v101_v42 }
  0x3b   :  { %v187_v43 = vpop.eup %186 }
  0x3c   :  { %v189_v44 = vpop.eup %188  ;;  %v103_v45 = vmul.f32 %v187_v43, %v100_v41  ;;  %vm109_vm2 = vweird.f32 %v187_v43 }
  0x3d   :  { %v113_v46 = vmul.f32 %v189_v44, %v101_v42  ;;  %vm119_vm4 = vweird.f32 %v189_v44  ;;  %vm110_vm5 = vmor %vm108_vm1, %vm109_vm2 }
  0x3e   :  { %v104_v47 = vmul.f32 %v187_v43, %v103_v45  ;;  %vm120_vm6 = vmor %vm118_vm3, %vm119_vm4 }
  0x3f   :  { %v114_v48 = vmul.f32 %v189_v44, %v113_v46 }
  0x40   :  { %v105_v49 = vmul.f32 0.5, %v104_v47 }
  0x41   :  { %v115_v50 = vmul.f32 0.5, %v114_v48 }
  0x42   :  { %v106_v51 = vsub.f32 1.5, %v105_v49 }
  0x43   :  { %v116_v53 = vsub.f32 1.5, %v115_v50 }
  0x44   :  { %v107_v54 = vmul.f32 %v187_v43, %v106_v51 }
  0x45   :  { %v117_v57 = vmul.f32 %v189_v44, %v116_v53 }
  0x46   :  { %v111_v58 = vsel %vm110_vm5, %v187_v43, %v107_v54 }
  0x47   :  { %v122_v60 = vmul.f32 %v111_v58, %v82_v23  ;;  %v121_v62 = vsel %vm120_vm6, %v189_v44, %v117_v57 }
  0x48   :  { %v123_v63 = vmul.f32 %v121_v62, %v83_v24 }
  0x49   :  { %v130_v1 = vmul.f32 %v126_v56, %v122_v60 }
  0x4a   :  { %v131_v2 = vmul.f32 %v127_v59, %v123_v63 }
  0x4b   :  { %v138_v3 = vadd.f32 %v134_v61, %v130_v1 }
  0x4c   :  { %v139_v4 = vadd.f32 %v135_v0, %v131_v2 }
  0x4d   :  { %140 = vst [vmem:[#allocation8] sm:$0xff] %v138_v3 }
  0x4e   :  { %141 = vst [vmem:[#allocation8 + $0x8] sm:$0xff] %v139_v4  ;;  %v142_v5 = vpack.c.bf16 %v139_v4, %v138_v3 }
  0x4f   :  { %154 = dma.vmem_to_hbm [thread:$0]  %s150_s2, 256, %s152_s5, [#allocation4]  }
  0x50   :  { %143 = vst [vmem:[#allocation9] sm:$0xff] %v142_v5 }
  0x51   :  { %165 = dma.vmem_to_hbm [thread:$0]  %s161_s7, 128, %s163_s10, [#allocation10]  }
  0x52   :  { %314 = dma.done.wait [#allocation4], 256  }
  0x53   :  { %315 = vsyncadd [#allocation4], 4294967040 }
  0x54   :  { %316 = dma.done.wait [#allocation10], 128  }
  0x55   :  { %317 = vsyncadd [#allocation10], 4294967168 }
  0x56   :  { %174 = vsyncpa [#allocation3], 1 }
  0x57   :  { %175 = vsyncpa [#allocation6], 1 }
  0x58   :  { %176 = vsyncpa [#allocation4], 1 }
  0x59   :  { %177 = vsyncpa [#allocation10], 1 }

</bundles_post_ra>
